<compile_context>
chip_gen: v5e
topology: v5e:2x2
jax: 0.10.0
libtpu: 0.0.40
codegen_flags: <defaults>
</compile_context>

<pallas_src>
import functools
import math

import jax
import jax.numpy as jnp
from jax.experimental import pallas as pl
from jax.experimental.pallas import tpu as pltpu


_INV_SQRT2 = 1.0 / math.sqrt(2.0)
_SQRT_2_OVER_PI = math.sqrt(2.0 / math.pi)


def _round_up(x, m):
    return ((x + m - 1) // m) * m


def _gelu_exact_f32(x):
    # PyTorch nn.GELU() default (exact erf), in f32.
    return 0.5 * x * (1.0 + jax.lax.erf(x * _INV_SQRT2))


def _gelu_tanh_f32(x):
    # tanh approximation; routes transcendental to EUP slot (flag-gated, not default).
    return 0.5 * x * (1.0 + jnp.tanh(_SQRT_2_OVER_PI * (x + 0.044715 * x * x * x)))


def _vmem_capacity_bytes():
    try:
        return int(pltpu.get_tpu_info().vmem_capacity_bytes)
    except Exception:
        return 128 * 1024 * 1024  # conservative default (v5e/v6e class)


# ---------------------------------------------------------------------------
# Kernel
# ---------------------------------------------------------------------------
def _mlp_kernel(x_ref, w1_ref, b1_ref, w2_ref, b2_ref, o_ref, acc_ref, *,
                use_tanh_gelu):
    # x_ref:  (tm, Dp)  bf16      w1_ref: (Dp, Hb) bf16   b1_ref: (1, Hb) f32
    # w2_ref: (Hb, Dp)  bf16      b2_ref: (1, Dp)  f32
    # o_ref:  (tm, Dp)  out dtype acc_ref:(tm, Dp) f32 scratch (resident over H axis)
    hb = pl.program_id(1)

    @pl.when(hb == 0)
    def _():
        acc_ref[...] = jnp.zeros_like(acc_ref)

    # First matmul on the MXU (bf16 inputs, f32 accumulation).
    h = jnp.dot(x_ref[...], w1_ref[...], preferred_element_type=jnp.float32)
    h = h + b1_ref[...]
    h = _gelu_tanh_f32(h) if use_tanh_gelu else _gelu_exact_f32(h)
    # Second matmul: activations back to bf16 for the MXU, accumulate in f32.
    acc_ref[...] += jnp.dot(h.astype(w2_ref.dtype), w2_ref[...],
                            preferred_element_type=jnp.float32)

    @pl.when(hb == pl.num_programs(1) - 1)
    def _():
        o_ref[...] = (acc_ref[...] + b2_ref[...]).astype(o_ref.dtype)


# ---------------------------------------------------------------------------
# One-time parameter preparation (hoisted out of the per-call hot path)
# ---------------------------------------------------------------------------
def prepare_mlp_params(w1, b1, w2, b2, *, hblk=None, compute_dtype=jnp.bfloat16):
    """Pad/cast weights once.  w1:(D,H)  b1:(H,)  w2:(H,D)  b2:(D,)."""
    D, H = w1.shape
    assert w2.shape == (H, D) and b1.shape == (H,) and b2.shape == (D,)

    vmem_cap = _vmem_capacity_bytes()
    if hblk is None:
        hblk = 1024 if vmem_cap >= 96 * 1024 * 1024 else 512

    D_pad = _round_up(max(D, 128), 128)
    hblk_eff = min(hblk, _round_up(H, 128))
    H_pad = _round_up(H, hblk_eff)

    cdt = compute_dtype
    if D_pad == D and H_pad == H:
        # Aligned: no padding copy, just (cheap) dtype cast.
        w1_p = w1.astype(cdt)
        w2_p = w2.astype(cdt)
    else:
        w1_p = jnp.zeros((D_pad, H_pad), cdt).at[:D, :H].set(w1.astype(cdt))
        w2_p = jnp.zeros((H_pad, D_pad), cdt).at[:H, :D].set(w2.astype(cdt))
    b1_p = jnp.zeros((1, H_pad), jnp.float32).at[0, :H].set(b1.astype(jnp.float32))
    b2_p = jnp.zeros((1, D_pad), jnp.float32).at[0, :D].set(b2.astype(jnp.float32))

    return dict(w1=w1_p, b1=b1_p, w2=w2_p, b2=b2_p,
                D=D, H=H, D_pad=D_pad, H_pad=H_pad, hblk=hblk_eff,
                compute_dtype=cdt, vmem_cap=vmem_cap)


# ---------------------------------------------------------------------------
# Tile selection (VMEM-aware, generation-aware)
# ---------------------------------------------------------------------------
def _select_tm(M, D_pad, hblk, out_bytes, vmem_cap, tm_hint=None):
    big_vmem = vmem_cap >= 96 * 1024 * 1024
    budget = int(vmem_cap * 0.55)  # leave headroom for compiler scratch / biases

    # Double-buffered bf16 weight blocks (W1 + W2).
    weight_bytes = 2 * 2 * (D_pad * hblk * 2)
    avail = max(budget - weight_bytes, 2 * 1024 * 1024)

    # Per-token-row VMEM footprint: x bf16 (2 bufs) + out (2 bufs) + f32 acc.
    per_row = D_pad * (2 * 2 + 2 * out_bytes + 4)
    tm_cap = max(16, (avail // per_row) // 16 * 16)

    tm_target = tm_hint if tm_hint is not None else (512 if big_vmem else 256)
    tm = min(tm_target, tm_cap, _round_up(M, 16))
    tm = max(16, (tm // 16) * 16)

    # Small-VMEM chips are v7x-like (2 TCs/chip): make sure the parallel token axis
    # has >=2 steps so both TensorCores get work.  (On single-TC chips we skip this;
    # fewer token tiles = less weight re-streaming.)
    if not big_vmem:
        while tm >= 32 and _round_up(M, tm) // tm < 2:
            tm = max(16, (tm // 2 // 16) * 16)
    return tm


# ---------------------------------------------------------------------------
# Forward wrapper
# ---------------------------------------------------------------------------
def mlp_forward(x, params, *, tm=None, out_dtype=None, use_tanh_gelu=False):
    """MLP forward using pre-prepared params.  x: (..., D)."""
    orig_shape = x.shape
    D = params["D"]
    assert orig_shape[-1] == D
    M = int(math.prod(orig_shape[:-1])) if len(orig_shape) > 1 else 1

    D_pad, H_pad, hblk = params["D_pad"], params["H_pad"], params["hblk"]
    cdt = params["compute_dtype"]
    vmem_cap = params["vmem_cap"]
    out_dtype = x.dtype if out_dtype is None else out_dtype
    out_bytes = jnp.dtype(out_dtype).itemsize

    tm_eff = _select_tm(M, D_pad, hblk, out_bytes, vmem_cap, tm_hint=tm)
    M_pad = _round_up(M, tm_eff)

    x2d = x.reshape(M, D)
    if M_pad == M and D_pad == D:
        x_p = x2d.astype(cdt)                      # aligned fast path: no pad copy
    else:
        x_p = jnp.zeros((M_pad, D_pad), cdt).at[:M, :D].set(x2d.astype(cdt))

    grid = (M_pad // tm_eff, H_pad // hblk)
    big_vmem = vmem_cap >= 96 * 1024 * 1024
    vmem_limit = (100 * 1024 * 1024 if big_vmem
                  else min(vmem_cap - 8 * 1024 * 1024, 52 * 1024 * 1024))

    H = params["H"]
    num_token_tiles = grid[0]
    cost = pl.CostEstimate(
        flops=4 * M_pad * D_pad * H_pad,
        transcendentals=M_pad * H_pad,
        bytes_accessed=(M_pad * D_pad * 2                 # x (bf16)
                        + M_pad * D_pad * out_bytes       # output
                        + num_token_tiles * 2 * D_pad * H_pad * 2  # W1+W2 re-streamed
                        + 4 * (H_pad + D_pad)),           # biases
    )

    kernel = functools.partial(_mlp_kernel, use_tanh_gelu=use_tanh_gelu)

    out_padded = pl.pallas_call(
        kernel,
        out_shape=jax.ShapeDtypeStruct((M_pad, D_pad), out_dtype),
        grid_spec=pltpu.PrefetchScalarGridSpec(
            num_scalar_prefetch=0,
            grid=grid,
            in_specs=[
                pl.BlockSpec((tm_eff, D_pad), lambda i, h: (i, 0)),   # x tile
                pl.BlockSpec((D_pad, hblk), lambda i, h: (0, h)),     # W1 H-block
                pl.BlockSpec((1, hblk), lambda i, h: (0, h)),         # b1 H-block
                pl.BlockSpec((hblk, D_pad), lambda i, h: (h, 0)),     # W2 H-block
                pl.BlockSpec((1, D_pad), lambda i, h: (0, 0)),        # b2 (constant)
            ],
            out_specs=pl.BlockSpec((tm_eff, D_pad), lambda i, h: (i, 0)),
            scratch_shapes=[pltpu.VMEM((tm_eff, D_pad), jnp.float32)],
        ),
        compiler_params=pltpu.CompilerParams(
            dimension_semantics=("parallel", "arbitrary"),
            vmem_limit_bytes=int(vmem_limit),
        ),
        cost_estimate=cost,
    )(x_p, params["w1"], params["b1"], params["w2"], params["b2"])

    if M_pad == M and D_pad == D:
        return out_padded.reshape(orig_shape).astype(out_dtype)
    return out_padded[:M, :D].reshape(orig_shape)


# Convenience: prepare + forward in one call (prefer prepare once + mlp_forward in loops).
def mlp_forward_unprepared(x, w1, b1, w2, b2, **kwargs):
    params = prepare_mlp_params(w1, b1, w2, b2)
    return mlp_forward(x, params, **kwargs)


if __name__ == "__main__":
    # Config: n_embed=32, hidden = 4*n_embed = 128; input (batch=2, seq=8, n_embed).
    n_embed = 32
    hidden = 4 * n_embed
    batch, seq = 2, 8

    key = jax.random.PRNGKey(0)
    kx, kw1, kb1, kw2, kb2 = jax.random.split(key, 5)

    x = jax.random.normal(kx, (batch, seq, n_embed), dtype=jnp.float32)

    # nn.Linear-style init: W1 (4E, E), b1 (4E,), W2 (E, 4E), b2 (E,)
    bound1 = 1.0 / math.sqrt(n_embed)
    w1_t = jax.random.uniform(kw1, (hidden, n_embed), minval=-bound1, maxval=bound1)
    b1 = jax.random.uniform(kb1, (hidden,), minval=-bound1, maxval=bound1)
    bound2 = 1.0 / math.sqrt(hidden)
    w2_t = jax.random.uniform(kw2, (n_embed, hidden), minval=-bound2, maxval=bound2)
    b2 = jax.random.uniform(kb2, (n_embed,), minval=-bound2, maxval=bound2)

    # Pre-transpose to (in, out) for the kernel's row-major matmul.
    w1 = w1_t.T  # (n_embed, hidden)
    w2 = w2_t.T  # (hidden, n_embed)

    # Prepare (pad/cast) weights ONCE, then run the kernel.
    params = prepare_mlp_params(w1, b1, w2, b2)
    out = mlp_forward(x, params)
    jax.block_until_ready(out)

    # Reference 1: same bf16-input / f32-accumulate recipe in plain JAX (tight check).
    x2d = x.reshape(batch * seq, n_embed)
    xb = x2d.astype(jnp.bfloat16)
    w1b = w1.astype(jnp.bfloat16)
    w2b = w2.astype(jnp.bfloat16)
    ref_h = jnp.dot(xb, w1b, preferred_element_type=jnp.float32) + b1
    ref_h = 0.5 * ref_h * (1.0 + jax.lax.erf(ref_h * _INV_SQRT2))
    ref_bf16 = (jnp.dot(ref_h.astype(jnp.bfloat16), w2b,
                        preferred_element_type=jnp.float32) + b2)
    ref_bf16 = ref_bf16.reshape(batch, seq, n_embed)
    assert jnp.allclose(out, ref_bf16, atol=2e-3, rtol=2e-3), "mismatch vs bf16 reference"

    # Reference 2: pure f32 reference (PyTorch nn.GELU exact-erf semantics), loose
    # tolerance to cover bf16 matmul truncation.
    ref_h32 = x2d @ w1 + b1
    ref_h32 = 0.5 * ref_h32 * (1.0 + jax.lax.erf(ref_h32 * _INV_SQRT2))
    ref_f32 = (ref_h32 @ w2 + b2).reshape(batch, seq, n_embed)
    assert jnp.allclose(out, ref_f32, atol=3e-2, rtol=3e-2), "mismatch vs f32 reference"

    print("KERNEL_OK")
</pallas_src>

<mosaic_0001>
module attributes {stable_mosaic.version = 11 : i64} {
  func.func @_mlp_kernel(%arg0: i32, %arg1: i32, %arg2: memref<16x128xbf16, #tpu.memory_space<vmem>>, %arg3: memref<128x128xbf16, #tpu.memory_space<vmem>>, %arg4: memref<1x128xf32, #tpu.memory_space<vmem>>, %arg5: memref<128x128xbf16, #tpu.memory_space<vmem>>, %arg6: memref<1x128xf32, #tpu.memory_space<vmem>>, %arg7: memref<16x128xf32, #tpu.memory_space<vmem>>, %arg8: memref<16x128xf32, #tpu.memory_space<vmem>>) attributes {dimension_semantics = [#tpu.dimension_semantics<parallel>, #tpu.dimension_semantics<arbitrary>], iteration_bounds = array<i64: 1, 1>, scalar_prefetch = 0 : i64, scratch_operands = 1 : i64, tpu.core_type = #tpu.core_type<tc>, window_params = [{transform_indices = @transform_0, window_bounds = array<i64: 16, 128>}, {transform_indices = @transform_1, window_bounds = array<i64: 128, 128>}, {transform_indices = @transform_2, window_bounds = array<i64: 1, 128>}, {transform_indices = @transform_3, window_bounds = array<i64: 128, 128>}, {pipeline_mode = #tpu.pipeline_mode<synchronous>, transform_indices = @transform_4, window_bounds = array<i64: 1, 128>}, {transform_indices = @transform_5, window_bounds = array<i64: 16, 128>}]} {
    %c0_i32 = arith.constant 0 : i32
    %0 = arith.cmpi eq, %arg1, %c0_i32 : i32
    %1 = arith.extui %0 : i1 to i32
    %c0_i32_0 = arith.constant 0 : i32
    %2 = arith.cmpi ne, %1, %c0_i32_0 : i32
    scf.if %2 {
      %cst_18 = arith.constant 0.000000e+00 : f32
      %26 = vector.broadcast %cst_18 : f32 to vector<16x128xf32>
      %c0_19 = arith.constant 0 : index
      %c0_20 = arith.constant 0 : index
      %27 = vector.load %arg8[%c0_19, %c0_20] : memref<16x128xf32, #tpu.memory_space<vmem>>, vector<16x128xf32>
      tpu.vector_store %arg8[%c0_19, %c0_20], %26 {strides = array<i32>} : memref<16x128xf32, #tpu.memory_space<vmem>>, vector<16x128xf32>,
    } else {
    }
    %c0 = arith.constant 0 : index
    %c0_1 = arith.constant 0 : index
    %3 = vector.load %arg2[%c0, %c0_1] : memref<16x128xbf16, #tpu.memory_space<vmem>>, vector<16x128xbf16>
    %c0_2 = arith.constant 0 : index
    %c0_3 = arith.constant 0 : index
    %4 = vector.load %arg3[%c0_2, %c0_3] : memref<128x128xbf16, #tpu.memory_space<vmem>>, vector<128x128xbf16>
    %cst = arith.constant dense<0.000000e+00> : vector<16x128xf32>
    %5 = tpu.matmul %3, %4, %cst {dimension_numbers = #tpu.dot_dimension_numbers<[1], [0], [0], [1], [0, 0, 1, 1], [], []>} : vector<16x128xbf16>, vector<128x128xbf16>, vector<16x128xf32> -> vector<16x128xf32>
    %c0_4 = arith.constant 0 : index
    %c0_5 = arith.constant 0 : index
    %6 = vector.load %arg4[%c0_4, %c0_5] : memref<1x128xf32, #tpu.memory_space<vmem>>, vector<1x128xf32>
    %7 = vector.broadcast %6 : vector<1x128xf32> to vector<16x128xf32>
    %8 = arith.addf %5, %7 : vector<16x128xf32>
    %cst_6 = arith.constant 5.000000e-01 : f32
    %9 = vector.broadcast %cst_6 : f32 to vector<16x128xf32>
    %10 = arith.mulf %9, %8 : vector<16x128xf32>
    %cst_7 = arith.constant 0.707106769 : f32
    %11 = vector.broadcast %cst_7 : f32 to vector<16x128xf32>
    %12 = arith.mulf %8, %11 : vector<16x128xf32>
    %13 = math.erf %12 : vector<16x128xf32>
    %cst_8 = arith.constant 1.000000e+00 : f32
    %14 = vector.broadcast %cst_8 : f32 to vector<16x128xf32>
    %15 = arith.addf %14, %13 : vector<16x128xf32>
    %16 = arith.mulf %10, %15 : vector<16x128xf32>
    %c0_9 = arith.constant 0 : index
    %c0_10 = arith.constant 0 : index
    %17 = vector.load %arg8[%c0_9, %c0_10] : memref<16x128xf32, #tpu.memory_space<vmem>>, vector<16x128xf32>
    %18 = arith.truncf %16 : vector<16x128xf32> to vector<16x128xbf16>
    %c0_11 = arith.constant 0 : index
    %c0_12 = arith.constant 0 : index
    %19 = vector.load %arg5[%c0_11, %c0_12] : memref<128x128xbf16, #tpu.memory_space<vmem>>, vector<128x128xbf16>
    %cst_13 = arith.constant dense<0.000000e+00> : vector<16x128xf32>
    %20 = tpu.matmul %18, %19, %cst_13 {dimension_numbers = #tpu.dot_dimension_numbers<[1], [0], [0], [1], [0, 0, 1, 1], [], []>} : vector<16x128xbf16>, vector<128x128xbf16>, vector<16x128xf32> -> vector<16x128xf32>
    %21 = arith.addf %17, %20 : vector<16x128xf32>
    %c0_14 = arith.constant 0 : index
    %c0_15 = arith.constant 0 : index
    %22 = vector.load %arg8[%c0_14, %c0_15] : memref<16x128xf32, #tpu.memory_space<vmem>>, vector<16x128xf32>
    tpu.vector_store %arg8[%c0_14, %c0_15], %21 {strides = array<i32>} : memref<16x128xf32, #tpu.memory_space<vmem>>, vector<16x128xf32>,
    %c0_i32_16 = arith.constant 0 : i32
    %23 = arith.cmpi eq, %arg1, %c0_i32_16 : i32
    %24 = arith.extui %23 : i1 to i32
    %c0_i32_17 = arith.constant 0 : i32
    %25 = arith.cmpi ne, %24, %c0_i32_17 : i32
    scf.if %25 {
      %c0_18 = arith.constant 0 : index
      %c0_19 = arith.constant 0 : index
      %26 = vector.load %arg8[%c0_18, %c0_19] : memref<16x128xf32, #tpu.memory_space<vmem>>, vector<16x128xf32>
      %c0_20 = arith.constant 0 : index
      %c0_21 = arith.constant 0 : index
      %27 = vector.load %arg6[%c0_20, %c0_21] : memref<1x128xf32, #tpu.memory_space<vmem>>, vector<1x128xf32>
      %28 = vector.broadcast %27 : vector<1x128xf32> to vector<16x128xf32>
      %29 = arith.addf %26, %28 : vector<16x128xf32>
      %c0_22 = arith.constant 0 : index
      %c0_23 = arith.constant 0 : index
      %30 = vector.load %arg7[%c0_22, %c0_23] : memref<16x128xf32, #tpu.memory_space<vmem>>, vector<16x128xf32>
      tpu.vector_store %arg7[%c0_22, %c0_23], %29 {strides = array<i32>} : memref<16x128xf32, #tpu.memory_space<vmem>>, vector<16x128xf32>,
    } else {
    }
    return
  }
  func.func @transform_0(%arg0: i32, %arg1: i32) -> (i32, i32) {
    %c0_i32 = arith.constant 0 : i32
    %c0_i32_0 = arith.constant 0 : i32
    return %arg0, %c0_i32 : i32, i32
  }
  func.func @transform_1(%arg0: i32, %arg1: i32) -> (i32, i32) {
    %c0_i32 = arith.constant 0 : i32
    %c0_i32_0 = arith.constant 0 : i32
    return %c0_i32, %arg1 : i32, i32
  }
  func.func @transform_2(%arg0: i32, %arg1: i32) -> (i32, i32) {
    %c0_i32 = arith.constant 0 : i32
    %c0_i32_0 = arith.constant 0 : i32
    return %c0_i32, %arg1 : i32, i32
  }
  func.func @transform_3(%arg0: i32, %arg1: i32) -> (i32, i32) {
    %c0_i32 = arith.constant 0 : i32
    %c0_i32_0 = arith.constant 0 : i32
    return %arg1, %c0_i32 : i32, i32
  }
  func.func @transform_4(%arg0: i32, %arg1: i32) -> (i32, i32) {
    %c0_i32 = arith.constant 0 : i32
    %c0_i32_0 = arith.constant 0 : i32
    %c0_i32_1 = arith.constant 0 : i32
    return %c0_i32, %c0_i32_0 : i32, i32
  }
  func.func @transform_5(%arg0: i32, %arg1: i32) -> (i32, i32) {
    %c0_i32 = arith.constant 0 : i32
    %c0_i32_0 = arith.constant 0 : i32
    return %arg0, %c0_i32 : i32, i32
  }
}

</mosaic_0001>

<bundles_post_ra>
// kernel: tpu_custom_call.1
= control target key start
LH: loop header
LB: loop body
LE: loop exit
PB: predicated region body
PF: predicated region fallthrough
CT: control target
= control target key end

     0   :  { %10 = vsyncpa [#allocation4], 0  ;;  %s647_s0 = inlined_call_operand.hbm [shape: bf16[16,128], index: 0, kind: input, shape index: {}]   ;;  %s648_s1 = inlined_call_operand.hbm [shape: bf16[128,128], index: 1, kind: input, shape index: {}]   ;;  %s649_s2 = inlined_call_operand.vmem [shape: f32[1,128], index: 2, kind: input, shape index: {}]   ;;  %s650_s3 = inlined_call_operand.hbm [shape: bf16[128,128], index: 3, kind: input, shape index: {}]   ;;  %s651_s4 = inlined_call_operand.vmem [shape: f32[1,128], index: 4, kind: input, shape index: {}]   ;;  %s652_s5 = inlined_call_operand.hbm [shape: f32[16,128], index: 5, kind: output, shape index: {}]  }
   0x1   :  { %11 = vsyncpa [#allocation7], 0 }
   0x2   :  { %12 = vsyncpa [#allocation5], 0  ;;  %s30_s20 = sshll.u32 %s648_s1, 4  ;;  %s573_s21 = smov [#allocation6]   ;;  %s31_s20 = int_to_ptr.hbm [resolvable:$true] %s30_s20 }
   0x3   :  { %s32_s22 = sshll.u32 %s573_s21, 4  ;;  %s17_s25 = sshll.u32 %s647_s0, 4  ;;  %s33_s22 = int_to_ptr.vmem [resolvable:$true] %s32_s22  ;;  %s18_s25 = int_to_ptr.hbm [resolvable:$true] %s17_s25 }
   0x4   :  { %s574_s26 = smov 64   ;;  %s575_s27 = smov 4  }
   0x5   :  { %38 = dma.hbm_to_vmem [thread:$0]  %s31_s20, 1024, %s33_s22, [#allocation7], %s574_s26, %s574_s26, %s575_s27  }
   0x6   :  { %s576_s28 = smov [#allocation3]   ;;  %s45_s7 = sshll.u32 %s650_s3, 4  ;;  %s46_s7 = int_to_ptr.hbm [resolvable:$true] %s45_s7 }
   0x7   :  { %s19_s29 = sshll.u32 %s576_s28, 4  ;;  %s577_s1 = smov [#allocation8]   ;;  %s20_s29 = int_to_ptr.vmem [resolvable:$true] %s19_s29 }
   0x8   :  { %25 = dma.hbm_to_vmem [thread:$0]  %s18_s25, 128, %s20_s29, [#allocation4], %s574_s26, %s574_s26, %s575_s27  }
   0x9   :  { %s47_s8 = sshll.u32 %s577_s1, 4  ;;  %s48_s8 = int_to_ptr.vmem [resolvable:$true] %s47_s8 }
   0xa   :  { %53 = dma.hbm_to_vmem [thread:$0]  %s46_s7, 1024, %s48_s8, [#allocation7], %s574_s26, %s574_s26, %s575_s27  }
   0xb   :  { %567 = dma.done.wait [#allocation4], 128  }
   0xc   :  { %568 = vsyncadd [#allocation4], 4294967168 }
   0xd   :  { %569 = dma.done.wait [#allocation7], 2048  }
   0xe   :  { %570 = vsyncadd [#allocation7], 4294965248  ;;  %v448_v0 = vld [vmem:[#allocation6 + $0x38] sm:$0xff]  ;;  %v447_v1 = vld [vmem:[#allocation6 + $0x30] sm:$0xff]  ;;  %s578_s10 = smov [#allocation9]   ;;  %s356_s14 = sshll.u32 %s652_s5, 4  ;;  %s357_s14 = int_to_ptr.hbm [resolvable:$true] %s356_s14 }
   0xf   :  { %150 = vmatpush.bf16.msra.mxu0 %v448_v0  ;;  %v446_v2 = vld [vmem:[#allocation6 + $0x28] sm:$0xff]  ;;  %v445_v3 = vld [vmem:[#allocation6 + $0x20] sm:$0xff]  ;;  %v444_v4 = vld [vmem:[#allocation6 + $0x18] sm:$0xff]  ;;  %s354_s11 = sshll.u32 %s578_s10, 4  ;;  %s579_s15 = smov 128   ;;  %s355_s11 = int_to_ptr.vmem [resolvable:$true] %s354_s11 }
  0x10   :  { %v443_v5 = vld [vmem:[#allocation6 + $0x10] sm:$0xff]  ;;  %v442_v6 = vld [vmem:[#allocation6 + $0x8] sm:$0xff]  ;;  %v441_v7 = vld [vmem:[#allocation6] sm:$0xff]  ;;  %s580_s16 = smov 8  }
  0x11   :  { %v440_v8 = vld [vmem:[#allocation3] sm:$0xff]  ;;  %v455_v14 = vld [vmem:[#allocation8 + $0x30] sm:$0xff]  ;;  %v454_v16 = vld [vmem:[#allocation8 + $0x28] sm:$0xff] }
  0x12   :  { %v465_v9 = vld [vmem:[%s649_s2] ss:$0 sm:$0xff]  ;;  %v453_v21 = vld [vmem:[#allocation8 + $0x20] sm:$0xff]  ;;  %v451_v33 = vld [vmem:[#allocation8 + $0x10] sm:$0xff] }
  0x13   :  { %151 = vmatpush.bf16.msra.mxu0 %v447_v1  ;;  %v456_v10 = vld [vmem:[#allocation8 + $0x38] sm:$0xff]  ;;  %v450_v41 = vld [vmem:[#allocation8 + $0x8] sm:$0xff]  ;;  %v449_v48 = vld [vmem:[#allocation8] sm:$0xff] }
  0x14   :  { %319 = vmatpush.bf16.msra.mxu1 %v456_v10  ;;  %v452_v27 = vld [vmem:[#allocation8 + $0x18] sm:$0xff] }
  0x17   :  { %152 = vmatpush.bf16.msra.mxu0 %v446_v2 }
  0x18   :  { %320 = vmatpush.bf16.msra.mxu1 %v455_v14 }
  0x1b   :  { %153 = vmatpush.bf16.msra.mxu0 %v445_v3 }
  0x1c   :  { %321 = vmatpush.bf16.msra.mxu1 %v454_v16 }
  0x1f   :  { %154 = vmatpush.bf16.msra.mxu0 %v444_v4 }
  0x20   :  { %322 = vmatpush.bf16.msra.mxu1 %v453_v21 }
  0x23   :  { %155 = vmatpush.bf16.msra.mxu0 %v443_v5 }
  0x24   :  { %323 = vmatpush.bf16.msra.mxu1 %v452_v27 }
  0x27   :  { %156 = vmatpush.bf16.msra.mxu0 %v442_v6 }
  0x28   :  { %324 = vmatpush.bf16.msra.mxu1 %v451_v33 }
  0x2b   :  { %157 = vmatpush.bf16.msra.mxu0 %v441_v7 }
  0x2c   :  { %325 = vmatpush.bf16.msra.mxu1 %v450_v41 }
  0x2e   :  { %158 = vmatmul.bf16.vlgmr.msra.gmra.mxu0 %v440_v8 }
  0x30   :  { %326 = vmatpush.bf16.msra.mxu1 %v449_v48 }
  0xab   :  { %v159_v11 = vpop.f32.mrf.mxu0 }
  0xac   :  { %v623_v12 = vadd.f32 %v465_v9, %v159_v11 }
  0xae   :  { %v626_v13 = vmul.f32 0.70710677, %v623_v12 }
  0xb0   :  { %v168_v15 = vmul.f32 %v626_v13, %v626_v13 }
  0xb2   :  { %v169_v17 = vmin.f32 %v168_v15, 16.0 }
  0xb3   :  { %v161_v18 = vpop.f32.mrf.mxu0 }
  0xb4   :  { %v170_v19 = vmul.f32 2.1237322e-06, %v169_v17  ;;  %v630_v20 = vadd.f32 %v465_v9, %v161_v18  ;;  %v181_v22 = vmul.f32 3.8918573e-05, %v169_v17 }
  0xb6   :  { %v171_v23 = vadd.f32 0.00028619796, %v170_v19  ;;  %v633_v24 = vmul.f32 0.70710677, %v630_v20  ;;  %v182_v25 = vadd.f32 0.001143296, %v181_v22 }
  0xb8   :  { %v208_v26 = vmul.f32 %v633_v24, %v633_v24  ;;  %v172_v28 = vmul.f32 %v171_v23, %v169_v17  ;;  %v183_v29 = vmul.f32 %v182_v25, %v169_v17 }
  0xba   :  { %v209_v30 = vmin.f32 %v208_v26, 16.0  ;;  %v184_v31 = vadd.f32 0.014752088, %v183_v29  ;;  %v173_v35 = vadd.f32 0.0036580483, %v172_v28 }
  0xbc   :  { %v210_v32 = vmul.f32 2.1237322e-06, %v209_v30  ;;  %v221_v34 = vmul.f32 3.8918573e-05, %v209_v30  ;;  %v185_v36 = vmul.f32 %v184_v31, %v169_v17  ;;  %v174_v43 = vmul.f32 %v173_v35, %v169_v17 }
  0xbd   :  { %v165_v35 = vmul.f32 0.5, %v630_v20 }
  0xbe   :  { %v211_v37 = vadd.f32 0.00028619796, %v210_v32  ;;  %v222_v38 = vadd.f32 0.001143296, %v221_v34  ;;  %v186_v39 = vadd.f32 0.112945676, %v185_v36 }
  0xbf   :  { %v175_v50 = vadd.f32 0.05243302, %v174_v43  ;;  %v164_v34 = vmul.f32 0.5, %v623_v12 }
  0xc0   :  { %v212_v40 = vmul.f32 %v211_v37, %v209_v30  ;;  %v223_v42 = vmul.f32 %v222_v38, %v209_v30  ;;  %v187_v44 = vmul.f32 %v186_v39, %v169_v17 }
  0xc1   :  { %v176_v56 = vmul.f32 %v175_v50, %v169_v17 }
  0xc2   :  { %v213_v45 = vadd.f32 0.0036580483, %v212_v40  ;;  %v224_v46 = vadd.f32 0.014752088, %v223_v42  ;;  %v188_v47 = vadd.f32 0.4994258, %v187_v44 }
  0xc3   :  { %v177_v60 = vadd.f32 0.18741608, %v176_v56 }
  0xc4   :  { %v225_v49 = vmul.f32 %v224_v46, %v209_v30  ;;  %v189_v51 = vmul.f32 %v188_v47, %v169_v17  ;;  %v214_v52 = vmul.f32 %v213_v45, %v209_v30 }
  0xc5   :  { %v178_v1 = vmul.f32 %v177_v60, %v169_v17 }
  0xc6   :  { %v226_v53 = vadd.f32 0.112945676, %v225_v49  ;;  %v190_v54 = vadd.f32 1.0, %v189_v51  ;;  %v215_v57 = vadd.f32 0.05243302, %v214_v52 }
  0xc7   :  { %v179_v7 = vadd.f32 1.1283791, %v178_v1 }
  0xc8   :  { %v227_v55 = vmul.f32 %v226_v53, %v209_v30  ;;  %467 = vrcp.f32 %v190_v54  ;;  %v216_v61 = vmul.f32 %v215_v57, %v209_v30  ;;  %v202_v4 = vand.u32 2147483648, %v190_v54 }
  0xc9   :  { %v200_v6 = vand.u32 2147483647, %v190_v54  ;;  %vm196_vm1 = vweird.f32 %v190_v54  ;;  %v180_v16 = vmul.f32 %v179_v7, %v626_v13 }
  0xca   :  { %v228_v58 = vadd.f32 0.4994258, %v227_v55  ;;  %v217_v2 = vadd.f32 0.18741608, %v216_v61  ;;  %v203_v11 = vor.u32 1.1754944e-38, %v202_v4 }
  0xcb   :  { %vm201_vm3 = vcmp.eq.f32.partialorder %v200_v6, 8.507059e+37 }
  0xcc   :  { %v229_v59 = vmul.f32 %v228_v58, %v209_v30  ;;  %v218_v9 = vmul.f32 %v217_v2, %v209_v30 }
  0xce   :  { %v230_v62 = vadd.f32 1.0, %v229_v59  ;;  %v468_v63 = vpop.eup %467  ;;  %v219_v19 = vadd.f32 1.1283791, %v218_v9 }
  0xcf   :  { %v192_v0 = vmul.f32 %v468_v63, %v190_v54  ;;  %vm197_vm0 = vweird.f32 %v468_v63 }
  0xd0   :  { %469 = vrcp.f32 %v230_v62  ;;  %vm198_vm2 = vmor %vm196_vm1, %vm197_vm0  ;;  %v242_v21 = vand.u32 2147483648, %v230_v62  ;;  %v240_v25 = vand.u32 2147483647, %v230_v62  ;;  %vm236_vm5 = vweird.f32 %v230_v62 }
  0xd1   :  { %v193_v3 = vsub.f32 1.0, %v192_v0  ;;  %v220_v28 = vmul.f32 %v219_v19, %v633_v24  ;;  %v466_v24 = vld [vmem:[%s651_s4] ss:$0 sm:$0xff] }
  0xd2   :  { %v243_v27 = vor.u32 1.1754944e-38, %v242_v21  ;;  %vm241_vm7 = vcmp.eq.f32.partialorder %v240_v25, 8.507059e+37 }
  0xd3   :  { %v194_v5 = vmul.f32 %v468_v63, %v193_v3 }
  0xd5   :  { %v195_v10 = vadd.f32 %v468_v63, %v194_v5 }
  0xd6   :  { %v470_v8 = vpop.eup %469 }
  0xd7   :  { %v232_v14 = vmul.f32 %v470_v8, %v230_v62  ;;  %v199_v15 = vsel %vm198_vm2, %v468_v63, %v195_v10  ;;  %vm237_vm4 = vweird.f32 %v470_v8 }
  0xd8   :  { %v204_v18 = vsel %vm201_vm3, %v203_v11, %v199_v15  ;;  %vm238_vm6 = vmor %vm236_vm5, %vm237_vm4 }
  0xd9   :  { %v233_v17 = vsub.f32 1.0, %v232_v14  ;;  %v205_v22 = vmul.f32 %v204_v18, %v180_v16 }
  0xdb   :  { %v234_v23 = vmul.f32 %v470_v8, %v233_v17  ;;  %v406_v29 = vclamps-f32 %v205_v22, 1.0 }
  0xdd   :  { %v235_v26 = vadd.f32 %v470_v8, %v234_v23  ;;  %v248_v33 = vadd.f32 1.0, %v406_v29 }
  0xdf   :  { %v239_v30 = vsel %vm238_vm6, %v470_v8, %v235_v26  ;;  %v250_v37 = vmul.f32 %v248_v33, %v164_v34 }
  0xe0   :  { %v244_v31 = vsel %vm241_vm7, %v243_v27, %v239_v30 }
  0xe1   :  { %v245_v32 = vmul.f32 %v244_v31, %v220_v28 }
  0xe3   :  { %v407_v13 = vclamps-f32 %v245_v32, 1.0 }
  0xe5   :  { %v249_v36 = vadd.f32 1.0, %v407_v13 }
  0xe7   :  { %v251_v38 = vmul.f32 %v249_v36, %v165_v35 }
  0xe9   :  { %v254_v39 = vpack.c.bf16 %v251_v38, %v250_v37 }
  0xeb   :  { %327 = vmatmul.bf16.vlgmr.msra.gmra.mxu1 %v254_v39 }
 0x168   :  { %v328_v40 = vpop.f32.mrf.mxu1 }
 0x169   :  { %v346_v41 = vadd.f32 %v466_v24, %v328_v40 }
 0x16b   :  { %348 = vst [vmem:[#allocation9] sm:$0xff] %v346_v41 }
 0x170   :  { %v330_v12 = vpop.f32.mrf.mxu1 }
 0x171   :  { %v347_v20 = vadd.f32 %v466_v24, %v330_v12 }
 0x173   :  { %349 = vst [vmem:[#allocation9 + $0x8] sm:$0xff] %v347_v20 }
 0x174   :  { %362 = dma.vmem_to_hbm [thread:$0]  %s355_s11, 256, %s357_s14, [#allocation5], %s579_s15, %s579_s15, %s580_s16  }
 0x175   :  { %571 = dma.done.wait [#allocation5], 256  }
 0x176   :  { %572 = vsyncadd [#allocation5], 4294967040 }
 0x177   :  { %367 = vsyncpa [#allocation4], 1 }
 0x178   :  { %368 = vsyncpa [#allocation7], 1 }
 0x179   :  { %369 = vsyncpa [#allocation5], 1 }

</bundles_post_ra>
